<compile_context>
chip_gen: v7x
topology: tpu7x:2x2x1
jax: 0.10.0
libtpu: 0.0.40
codegen_flags: <defaults>
</compile_context>

<pallas_src>
import functools

import jax
import jax.numpy as jnp
from jax import lax
from jax.experimental import pallas as pl
from jax.experimental.pallas import tpu as pltpu


def _round_up(x, m):
    return ((x + m - 1) // m) * m


def _double_conv_kernel(x_ref, mask_ref, w1_ref, b1_ref, w2_ref, b2_ref,
                        o_ref, pad_ref, patch_ref,
                        *, H, W, Cin, Cout, CPi, CPo, PADF):
    """Fused (conv3x3 pad=1 -> ReLU) x 2 for one batch element.

    x_ref    : (1, Cin, H*W)      input, channels-major, spatial flattened
    mask_ref : (2, H*W)           row 0: 0 where x==0, row 1: 0 where x==W-1
    w1_ref   : (Cout, 9*CPi)      layer-1 weights, column = (ky*3+kx)*CPi + ci
    b1_ref   : (Cout, 1)
    w2_ref   : (Cout, 9*CPo)      layer-2 weights
    b2_ref   : (Cout, 1)
    o_ref    : (1, Cout, H*W)     output
    pad_ref  : (CPmax, PADF+H*W+PADF) VMEM scratch: flat activation with zero halo
    patch_ref: (9*CPmax, H*W)     VMEM scratch: im2col slab
    """
    HW = H * W

    ml = mask_ref[0:1, :].astype(jnp.float32)   # zero where x == 0
    mr = mask_ref[1:2, :].astype(jnp.float32)   # zero where x == W-1

    # Zero the flat padded-activation scratch; the halo regions stay zero
    # (vertical padding comes for free from these zeros).
    pad_ref[...] = jnp.zeros_like(pad_ref)

    def conv3x3_relu(act, c_act, cp, w_r, b_c):
        # act: (c_act, HW) f32. Store into the (lane-aligned) interior.
        pad_ref[0:c_act, PADF:PADF + HW] = act
        flat = pad_ref[0:cp, :]                               # (cp, HWP)
        # Build the im2col slab: 9 shifted (and column-masked) copies.
        for ky in range(3):
            for kx in range(3):
                t = ky * 3 + kx
                start = PADF + (ky - 1) * W + (kx - 1)
                p = flat[:, start:start + HW]                 # (cp, HW)
                if kx == 0:
                    p = p * ml     # left neighbor invalid at x == 0
                elif kx == 2:
                    p = p * mr     # right neighbor invalid at x == W-1
                patch_ref[t * cp:(t + 1) * cp, :] = p
        patches = patch_ref[0:9 * cp, :]                      # (9*cp, HW)
        acc = lax.dot_general(
            w_r, patches,
            dimension_numbers=(((1,), (0,)), ((), ())),
            preferred_element_type=jnp.float32)               # (Cout, HW) lane-dense
        return jnp.maximum(acc + b_c, 0.0)

    x = x_ref[0].astype(jnp.float32)                          # (Cin, HW)
    h = conv3x3_relu(x, Cin, CPi,
                     w1_ref[...].astype(jnp.float32),
                     b1_ref[...].astype(jnp.float32))         # (Cout, HW), stays in VMEM
    y = conv3x3_relu(h, Cout, CPo,
                     w2_ref[...].astype(jnp.float32),
                     b2_ref[...].astype(jnp.float32))         # (Cout, HW)
    o_ref[0] = y.astype(o_ref.dtype)


def _prep_weight(w_oihw, cp_in):
    """(Cout, Cin, 3, 3) -> (Cout, 9*cp_in), column index = (ky*3+kx)*cp_in + ci.

    Channels ci >= Cin are zero so padded/stale scratch rows contribute nothing.
    """
    co, ci, kh, kw = w_oihw.shape
    w = jnp.transpose(w_oihw, (2, 3, 1, 0))                   # (ky, kx, ci, co)
    w = jnp.pad(w, ((0, 0), (0, 0), (0, cp_in - ci), (0, 0)))
    w = w.reshape(kh * kw * cp_in, co)
    return jnp.transpose(w, (1, 0))


def init_double_conv_params(key, in_ch, out_ch, dtype=jnp.float32):
    """PyTorch-style Conv2d default init; weights stored OIHW like nn.Conv2d."""
    k1, k2, k3, k4 = jax.random.split(key, 4)
    bound1 = 1.0 / (in_ch * 9) ** 0.5
    bound2 = 1.0 / (out_ch * 9) ** 0.5
    w1 = jax.random.uniform(k1, (out_ch, in_ch, 3, 3), dtype, -bound1, bound1)
    b1 = jax.random.uniform(k2, (out_ch,), dtype, -bound1, bound1)
    w2 = jax.random.uniform(k3, (out_ch, out_ch, 3, 3), dtype, -bound2, bound2)
    b2 = jax.random.uniform(k4, (out_ch,), dtype, -bound2, bound2)
    return {"w1": w1, "b1": b1, "w2": w2, "b2": b2}


def double_conv_forward(x_nchw, params):
    """Pallas implementation of double_conv.forward. Input/output NCHW."""
    N, Cin, H, W = x_nchw.shape
    Cout = params["w1"].shape[0]
    HW = H * W
    CPi = _round_up(Cin, 8)          # channel padding -> aligned sublane stores
    CPo = _round_up(Cout, 8)
    CPmax = max(CPi, CPo)
    PADF = _round_up(W + 1, 128)     # lane-aligned halo offset in the flat buffer
    HWP = PADF + HW + PADF

    # Free (contiguous) reshape: keep NCHW, just flatten spatial dims.
    x2 = x_nchw.reshape(N, Cin, HW)

    # Tiny weight/bias re-layouts (a few KB), done outside the kernel.
    w1r = _prep_weight(params["w1"], CPi)      # (Cout, 9*CPi)
    w2r = _prep_weight(params["w2"], CPo)      # (Cout, 9*CPo)
    b1c = params["b1"].reshape(Cout, 1)
    b2c = params["b2"].reshape(Cout, 1)

    # Column-boundary masks for the horizontal taps (flattened-row trick).
    xs = jnp.arange(HW, dtype=jnp.int32) % W
    col_mask = jnp.stack([(xs != 0), (xs != W - 1)]).astype(x_nchw.dtype)  # (2, HW)

    kernel = functools.partial(
        _double_conv_kernel,
        H=H, W=W, Cin=Cin, Cout=Cout, CPi=CPi, CPo=CPo, PADF=PADF)

    out = pl.pallas_call(
        kernel,
        out_shape=jax.ShapeDtypeStruct((N, Cout, HW), x_nchw.dtype),
        grid_spec=pltpu.PrefetchScalarGridSpec(
            num_scalar_prefetch=0,
            grid=(N,),
            in_specs=[
                pl.BlockSpec((1, Cin, HW), lambda n: (n, 0, 0)),
                pl.BlockSpec((2, HW), lambda n: (0, 0)),
                pl.BlockSpec((Cout, 9 * CPi), lambda n: (0, 0)),
                pl.BlockSpec((Cout, 1), lambda n: (0, 0)),
                pl.BlockSpec((Cout, 9 * CPo), lambda n: (0, 0)),
                pl.BlockSpec((Cout, 1), lambda n: (0, 0)),
            ],
            out_specs=pl.BlockSpec((1, Cout, HW), lambda n: (n, 0, 0)),
            scratch_shapes=[
                pltpu.VMEM((CPmax, HWP), jnp.float32),      # flat padded activation
                pltpu.VMEM((9 * CPmax, HW), jnp.float32),   # im2col slab
            ],
        ),
        compiler_params=pltpu.CompilerParams(
            dimension_semantics=("parallel",)),
    )(x2, col_mask, w1r, b1c, w2r, b2c)

    return out.reshape(N, Cout, H, W)          # free reshape back to NCHW


def _reference_forward(x_nchw, params):
    """Plain-JAX reference (NCHW conv) for correctness check."""
    def conv(x, w_oihw, b):
        y = lax.conv_general_dilated(
            x, w_oihw, window_strides=(1, 1), padding=((1, 1), (1, 1)),
            dimension_numbers=("NCHW", "OIHW", "NCHW"))
        return jnp.maximum(y + b[None, :, None, None], 0.0)
    h = conv(x_nchw, params["w1"], params["b1"])
    return conv(h, params["w2"], params["b2"])


if __name__ == "__main__":
    N, in_ch, out_ch, H, W = 2, 4, 8, 16, 16
    key = jax.random.PRNGKey(0)
    kx, kp = jax.random.split(key)
    x = jax.random.normal(kx, (N, in_ch, H, W), jnp.float32)
    params = init_double_conv_params(kp, in_ch, out_ch)

    out = double_conv_forward(x, params)
    out = jax.block_until_ready(out)

    ref = _reference_forward(x, params)
    assert out.shape == (N, out_ch, H, W)
    assert jnp.allclose(out, ref, atol=1e-4, rtol=1e-4), "mismatch vs reference"
    print("KERNEL_OK")
</pallas_src>

<mosaic_0001>
module attributes {stable_mosaic.version = 11 : i64} {
  func.func @_double_conv_kernel(%arg0: i32, %arg1: memref<1x4x256xf32, #tpu.memory_space<vmem>>, %arg2: memref<2x256xf32, #tpu.memory_space<vmem>>, %arg3: memref<8x72xf32, #tpu.memory_space<vmem>>, %arg4: memref<8x1xf32, #tpu.memory_space<vmem>>, %arg5: memref<8x72xf32, #tpu.memory_space<vmem>>, %arg6: memref<8x1xf32, #tpu.memory_space<vmem>>, %arg7: memref<1x8x256xf32, #tpu.memory_space<vmem>>, %arg8: memref<8x512xf32, #tpu.memory_space<vmem>>, %arg9: memref<72x256xf32, #tpu.memory_space<vmem>>) attributes {dimension_semantics = [#tpu.dimension_semantics<parallel>], iteration_bounds = array<i64: 2>, scalar_prefetch = 0 : i64, scratch_operands = 2 : i64, tpu.core_type = #tpu.core_type<tc>, window_params = [{transform_indices = @transform_0, window_bounds = array<i64: 1, 4, 256>}, {pipeline_mode = #tpu.pipeline_mode<synchronous>, transform_indices = @transform_1, window_bounds = array<i64: 2, 256>}, {pipeline_mode = #tpu.pipeline_mode<synchronous>, transform_indices = @transform_2, window_bounds = array<i64: 8, 72>}, {pipeline_mode = #tpu.pipeline_mode<synchronous>, transform_indices = @transform_3, window_bounds = array<i64: 8, 1>}, {pipeline_mode = #tpu.pipeline_mode<synchronous>, transform_indices = @transform_4, window_bounds = array<i64: 8, 72>}, {pipeline_mode = #tpu.pipeline_mode<synchronous>, transform_indices = @transform_5, window_bounds = array<i64: 8, 1>}, {transform_indices = @transform_6, window_bounds = array<i64: 1, 8, 256>}]} {
    %c0 = arith.constant 0 : index
    %c0_0 = arith.constant 0 : index
    %0 = vector.load %arg2[%c0, %c0_0] : memref<2x256xf32, #tpu.memory_space<vmem>>, vector<1x256xf32>
    %c1 = arith.constant 1 : index
    %c0_1 = arith.constant 0 : index
    %1 = vector.load %arg2[%c1, %c0_1] : memref<2x256xf32, #tpu.memory_space<vmem>>, vector<1x256xf32>
    %cst = arith.constant 0.000000e+00 : f32
    %2 = vector.broadcast %cst : f32 to vector<8x512xf32>
    %c0_2 = arith.constant 0 : index
    %c0_3 = arith.constant 0 : index
    %3 = vector.load %arg8[%c0_2, %c0_3] : memref<8x512xf32, #tpu.memory_space<vmem>>, vector<8x512xf32>
    tpu.vector_store %arg8[%c0_2, %c0_3], %2 {strides = array<i32>} : memref<8x512xf32, #tpu.memory_space<vmem>>, vector<8x512xf32>,
    %c0_4 = arith.constant 0 : index
    %c0_5 = arith.constant 0 : index
    %c0_6 = arith.constant 0 : index
    %4 = vector.load %arg1[%c0_4, %c0_5, %c0_6] : memref<1x4x256xf32, #tpu.memory_space<vmem>>, vector<1x4x256xf32>
    %5 = vector.shape_cast %4 : vector<1x4x256xf32> to vector<4x256xf32>
    %c0_7 = arith.constant 0 : index
    %c0_8 = arith.constant 0 : index
    %6 = vector.load %arg3[%c0_7, %c0_8] : memref<8x72xf32, #tpu.memory_space<vmem>>, vector<8x72xf32>
    %c0_9 = arith.constant 0 : index
    %c0_10 = arith.constant 0 : index
    %7 = vector.load %arg4[%c0_9, %c0_10] : memref<8x1xf32, #tpu.memory_space<vmem>>, vector<8x1xf32>
    %c0_11 = arith.constant 0 : index
    %c128 = arith.constant 128 : index
    %8 = vector.load %arg8[%c0_11, %c128] : memref<8x512xf32, #tpu.memory_space<vmem>>, vector<4x256xf32>
    tpu.vector_store %arg8[%c0_11, %c128], %5 {strides = array<i32>} : memref<8x512xf32, #tpu.memory_space<vmem>>, vector<4x256xf32>,
    %c0_12 = arith.constant 0 : index
    %c0_13 = arith.constant 0 : index
    %9 = vector.load %arg8[%c0_12, %c0_13] : memref<8x512xf32, #tpu.memory_space<vmem>>, vector<8x512xf32>
    %10 = vector.extract_strided_slice %9 {offsets = [0, 111], sizes = [8, 256], strides = [1, 1]} : vector<8x512xf32> to vector<8x256xf32>
    %11 = vector.broadcast %0 : vector<1x256xf32> to vector<8x256xf32>
    %12 = arith.mulf %10, %11 : vector<8x256xf32>
    %c0_14 = arith.constant 0 : index
    %c0_15 = arith.constant 0 : index
    %13 = vector.load %arg9[%c0_14, %c0_15] : memref<72x256xf32, #tpu.memory_space<vmem>>, vector<8x256xf32>
    tpu.vector_store %arg9[%c0_14, %c0_15], %12 {strides = array<i32>} : memref<72x256xf32, #tpu.memory_space<vmem>>, vector<8x256xf32>,
    %14 = vector.extract_strided_slice %9 {offsets = [0, 112], sizes = [8, 256], strides = [1, 1]} : vector<8x512xf32> to vector<8x256xf32>
    %c8 = arith.constant 8 : index
    %c0_16 = arith.constant 0 : index
    %15 = vector.load %arg9[%c8, %c0_16] : memref<72x256xf32, #tpu.memory_space<vmem>>, vector<8x256xf32>
    tpu.vector_store %arg9[%c8, %c0_16], %14 {strides = array<i32>} : memref<72x256xf32, #tpu.memory_space<vmem>>, vector<8x256xf32>,
    %16 = vector.extract_strided_slice %9 {offsets = [0, 113], sizes = [8, 256], strides = [1, 1]} : vector<8x512xf32> to vector<8x256xf32>
    %17 = vector.broadcast %1 : vector<1x256xf32> to vector<8x256xf32>
    %18 = arith.mulf %16, %17 : vector<8x256xf32>
    %c16 = arith.constant 16 : index
    %c0_17 = arith.constant 0 : index
    %19 = vector.load %arg9[%c16, %c0_17] : memref<72x256xf32, #tpu.memory_space<vmem>>, vector<8x256xf32>
    tpu.vector_store %arg9[%c16, %c0_17], %18 {strides = array<i32>} : memref<72x256xf32, #tpu.memory_space<vmem>>, vector<8x256xf32>,
    %20 = vector.extract_strided_slice %9 {offsets = [0, 127], sizes = [8, 256], strides = [1, 1]} : vector<8x512xf32> to vector<8x256xf32>
    %21 = vector.broadcast %0 : vector<1x256xf32> to vector<8x256xf32>
    %22 = arith.mulf %20, %21 : vector<8x256xf32>
    %c24 = arith.constant 24 : index
    %c0_18 = arith.constant 0 : index
    %23 = vector.load %arg9[%c24, %c0_18] : memref<72x256xf32, #tpu.memory_space<vmem>>, vector<8x256xf32>
    tpu.vector_store %arg9[%c24, %c0_18], %22 {strides = array<i32>} : memref<72x256xf32, #tpu.memory_space<vmem>>, vector<8x256xf32>,
    %24 = vector.extract_strided_slice %9 {offsets = [0, 128], sizes = [8, 256], strides = [1, 1]} : vector<8x512xf32> to vector<8x256xf32>
    %c32 = arith.constant 32 : index
    %c0_19 = arith.constant 0 : index
    %25 = vector.load %arg9[%c32, %c0_19] : memref<72x256xf32, #tpu.memory_space<vmem>>, vector<8x256xf32>
    tpu.vector_store %arg9[%c32, %c0_19], %24 {strides = array<i32>} : memref<72x256xf32, #tpu.memory_space<vmem>>, vector<8x256xf32>,
    %26 = vector.extract_strided_slice %9 {offsets = [0, 129], sizes = [8, 256], strides = [1, 1]} : vector<8x512xf32> to vector<8x256xf32>
    %27 = vector.broadcast %1 : vector<1x256xf32> to vector<8x256xf32>
    %28 = arith.mulf %26, %27 : vector<8x256xf32>
    %c40 = arith.constant 40 : index
    %c0_20 = arith.constant 0 : index
    %29 = vector.load %arg9[%c40, %c0_20] : memref<72x256xf32, #tpu.memory_space<vmem>>, vector<8x256xf32>
    tpu.vector_store %arg9[%c40, %c0_20], %28 {strides = array<i32>} : memref<72x256xf32, #tpu.memory_space<vmem>>, vector<8x256xf32>,
    %30 = vector.extract_strided_slice %9 {offsets = [0, 143], sizes = [8, 256], strides = [1, 1]} : vector<8x512xf32> to vector<8x256xf32>
    %31 = vector.broadcast %0 : vector<1x256xf32> to vector<8x256xf32>
    %32 = arith.mulf %30, %31 : vector<8x256xf32>
    %c48 = arith.constant 48 : index
    %c0_21 = arith.constant 0 : index
    %33 = vector.load %arg9[%c48, %c0_21] : memref<72x256xf32, #tpu.memory_space<vmem>>, vector<8x256xf32>
    tpu.vector_store %arg9[%c48, %c0_21], %32 {strides = array<i32>} : memref<72x256xf32, #tpu.memory_space<vmem>>, vector<8x256xf32>,
    %34 = vector.extract_strided_slice %9 {offsets = [0, 144], sizes = [8, 256], strides = [1, 1]} : vector<8x512xf32> to vector<8x256xf32>
    %c56 = arith.constant 56 : index
    %c0_22 = arith.constant 0 : index
    %35 = vector.load %arg9[%c56, %c0_22] : memref<72x256xf32, #tpu.memory_space<vmem>>, vector<8x256xf32>
    tpu.vector_store %arg9[%c56, %c0_22], %34 {strides = array<i32>} : memref<72x256xf32, #tpu.memory_space<vmem>>, vector<8x256xf32>,
    %36 = vector.extract_strided_slice %9 {offsets = [0, 145], sizes = [8, 256], strides = [1, 1]} : vector<8x512xf32> to vector<8x256xf32>
    %37 = vector.broadcast %1 : vector<1x256xf32> to vector<8x256xf32>
    %38 = arith.mulf %36, %37 : vector<8x256xf32>
    %c64 = arith.constant 64 : index
    %c0_23 = arith.constant 0 : index
    %39 = vector.load %arg9[%c64, %c0_23] : memref<72x256xf32, #tpu.memory_space<vmem>>, vector<8x256xf32>
    tpu.vector_store %arg9[%c64, %c0_23], %38 {strides = array<i32>} : memref<72x256xf32, #tpu.memory_space<vmem>>, vector<8x256xf32>,
    %c0_24 = arith.constant 0 : index
    %c0_25 = arith.constant 0 : index
    %40 = vector.load %arg9[%c0_24, %c0_25] : memref<72x256xf32, #tpu.memory_space<vmem>>, vector<72x256xf32>
    %cst_26 = arith.constant dense<0.000000e+00> : vector<8x256xf32>
    %41 = tpu.matmul %6, %40, %cst_26 {dimension_numbers = #tpu.dot_dimension_numbers<[1], [0], [0], [1], [0, 0, 1, 1], [], []>} : vector<8x72xf32>, vector<72x256xf32>, vector<8x256xf32> -> vector<8x256xf32>
    %42 = vector.broadcast %7 : vector<8x1xf32> to vector<8x256xf32>
    %43 = arith.addf %41, %42 : vector<8x256xf32>
    %cst_27 = arith.constant 0.000000e+00 : f32
    %44 = vector.broadcast %cst_27 : f32 to vector<8x256xf32>
    %45 = arith.maximumf %43, %44 : vector<8x256xf32>
    %c0_28 = arith.constant 0 : index
    %c0_29 = arith.constant 0 : index
    %46 = vector.load %arg5[%c0_28, %c0_29] : memref<8x72xf32, #tpu.memory_space<vmem>>, vector<8x72xf32>
    %c0_30 = arith.constant 0 : index
    %c0_31 = arith.constant 0 : index
    %47 = vector.load %arg6[%c0_30, %c0_31] : memref<8x1xf32, #tpu.memory_space<vmem>>, vector<8x1xf32>
    %c0_32 = arith.constant 0 : index
    %c128_33 = arith.constant 128 : index
    %48 = vector.load %arg8[%c0_32, %c128_33] : memref<8x512xf32, #tpu.memory_space<vmem>>, vector<8x256xf32>
    tpu.vector_store %arg8[%c0_32, %c128_33], %45 {strides = array<i32>} : memref<8x512xf32, #tpu.memory_space<vmem>>, vector<8x256xf32>,
    %c0_34 = arith.constant 0 : index
    %c0_35 = arith.constant 0 : index
    %49 = vector.load %arg8[%c0_34, %c0_35] : memref<8x512xf32, #tpu.memory_space<vmem>>, vector<8x512xf32>
    %50 = vector.extract_strided_slice %49 {offsets = [0, 111], sizes = [8, 256], strides = [1, 1]} : vector<8x512xf32> to vector<8x256xf32>
    %51 = vector.broadcast %0 : vector<1x256xf32> to vector<8x256xf32>
    %52 = arith.mulf %50, %51 : vector<8x256xf32>
    %c0_36 = arith.constant 0 : index
    %c0_37 = arith.constant 0 : index
    %53 = vector.load %arg9[%c0_36, %c0_37] : memref<72x256xf32, #tpu.memory_space<vmem>>, vector<8x256xf32>
    tpu.vector_store %arg9[%c0_36, %c0_37], %52 {strides = array<i32>} : memref<72x256xf32, #tpu.memory_space<vmem>>, vector<8x256xf32>,
    %54 = vector.extract_strided_slice %49 {offsets = [0, 112], sizes = [8, 256], strides = [1, 1]} : vector<8x512xf32> to vector<8x256xf32>
    %c8_38 = arith.constant 8 : index
    %c0_39 = arith.constant 0 : index
    %55 = vector.load %arg9[%c8_38, %c0_39] : memref<72x256xf32, #tpu.memory_space<vmem>>, vector<8x256xf32>
    tpu.vector_store %arg9[%c8_38, %c0_39], %54 {strides = array<i32>} : memref<72x256xf32, #tpu.memory_space<vmem>>, vector<8x256xf32>,
    %56 = vector.extract_strided_slice %49 {offsets = [0, 113], sizes = [8, 256], strides = [1, 1]} : vector<8x512xf32> to vector<8x256xf32>
    %57 = vector.broadcast %1 : vector<1x256xf32> to vector<8x256xf32>
    %58 = arith.mulf %56, %57 : vector<8x256xf32>
    %c16_40 = arith.constant 16 : index
    %c0_41 = arith.constant 0 : index
    %59 = vector.load %arg9[%c16_40, %c0_41] : memref<72x256xf32, #tpu.memory_space<vmem>>, vector<8x256xf32>
    tpu.vector_store %arg9[%c16_40, %c0_41], %58 {strides = array<i32>} : memref<72x256xf32, #tpu.memory_space<vmem>>, vector<8x256xf32>,
    %60 = vector.extract_strided_slice %49 {offsets = [0, 127], sizes = [8, 256], strides = [1, 1]} : vector<8x512xf32> to vector<8x256xf32>
    %61 = vector.broadcast %0 : vector<1x256xf32> to vector<8x256xf32>
    %62 = arith.mulf %60, %61 : vector<8x256xf32>
    %c24_42 = arith.constant 24 : index
    %c0_43 = arith.constant 0 : index
    %63 = vector.load %arg9[%c24_42, %c0_43] : memref<72x256xf32, #tpu.memory_space<vmem>>, vector<8x256xf32>
    tpu.vector_store %arg9[%c24_42, %c0_43], %62 {strides = array<i32>} : memref<72x256xf32, #tpu.memory_space<vmem>>, vector<8x256xf32>,
    %64 = vector.extract_strided_slice %49 {offsets = [0, 128], sizes = [8, 256], strides = [1, 1]} : vector<8x512xf32> to vector<8x256xf32>
    %c32_44 = arith.constant 32 : index
    %c0_45 = arith.constant 0 : index
    %65 = vector.load %arg9[%c32_44, %c0_45] : memref<72x256xf32, #tpu.memory_space<vmem>>, vector<8x256xf32>
    tpu.vector_store %arg9[%c32_44, %c0_45], %64 {strides = array<i32>} : memref<72x256xf32, #tpu.memory_space<vmem>>, vector<8x256xf32>,
    %66 = vector.extract_strided_slice %49 {offsets = [0, 129], sizes = [8, 256], strides = [1, 1]} : vector<8x512xf32> to vector<8x256xf32>
    %67 = vector.broadcast %1 : vector<1x256xf32> to vector<8x256xf32>
    %68 = arith.mulf %66, %67 : vector<8x256xf32>
    %c40_46 = arith.constant 40 : index
    %c0_47 = arith.constant 0 : index
    %69 = vector.load %arg9[%c40_46, %c0_47] : memref<72x256xf32, #tpu.memory_space<vmem>>, vector<8x256xf32>
    tpu.vector_store %arg9[%c40_46, %c0_47], %68 {strides = array<i32>} : memref<72x256xf32, #tpu.memory_space<vmem>>, vector<8x256xf32>,
    %70 = vector.extract_strided_slice %49 {offsets = [0, 143], sizes = [8, 256], strides = [1, 1]} : vector<8x512xf32> to vector<8x256xf32>
    %71 = vector.broadcast %0 : vector<1x256xf32> to vector<8x256xf32>
    %72 = arith.mulf %70, %71 : vector<8x256xf32>
    %c48_48 = arith.constant 48 : index
    %c0_49 = arith.constant 0 : index
    %73 = vector.load %arg9[%c48_48, %c0_49] : memref<72x256xf32, #tpu.memory_space<vmem>>, vector<8x256xf32>
    tpu.vector_store %arg9[%c48_48, %c0_49], %72 {strides = array<i32>} : memref<72x256xf32, #tpu.memory_space<vmem>>, vector<8x256xf32>,
    %74 = vector.extract_strided_slice %49 {offsets = [0, 144], sizes = [8, 256], strides = [1, 1]} : vector<8x512xf32> to vector<8x256xf32>
    %c56_50 = arith.constant 56 : index
    %c0_51 = arith.constant 0 : index
    %75 = vector.load %arg9[%c56_50, %c0_51] : memref<72x256xf32, #tpu.memory_space<vmem>>, vector<8x256xf32>
    tpu.vector_store %arg9[%c56_50, %c0_51], %74 {strides = array<i32>} : memref<72x256xf32, #tpu.memory_space<vmem>>, vector<8x256xf32>,
    %76 = vector.extract_strided_slice %49 {offsets = [0, 145], sizes = [8, 256], strides = [1, 1]} : vector<8x512xf32> to vector<8x256xf32>
    %77 = vector.broadcast %1 : vector<1x256xf32> to vector<8x256xf32>
    %78 = arith.mulf %76, %77 : vector<8x256xf32>
    %c64_52 = arith.constant 64 : index
    %c0_53 = arith.constant 0 : index
    %79 = vector.load %arg9[%c64_52, %c0_53] : memref<72x256xf32, #tpu.memory_space<vmem>>, vector<8x256xf32>
    tpu.vector_store %arg9[%c64_52, %c0_53], %78 {strides = array<i32>} : memref<72x256xf32, #tpu.memory_space<vmem>>, vector<8x256xf32>,
    %c0_54 = arith.constant 0 : index
    %c0_55 = arith.constant 0 : index
    %80 = vector.load %arg9[%c0_54, %c0_55] : memref<72x256xf32, #tpu.memory_space<vmem>>, vector<72x256xf32>
    %cst_56 = arith.constant dense<0.000000e+00> : vector<8x256xf32>
    %81 = tpu.matmul %46, %80, %cst_56 {dimension_numbers = #tpu.dot_dimension_numbers<[1], [0], [0], [1], [0, 0, 1, 1], [], []>} : vector<8x72xf32>, vector<72x256xf32>, vector<8x256xf32> -> vector<8x256xf32>
    %82 = vector.broadcast %47 : vector<8x1xf32> to vector<8x256xf32>
    %83 = arith.addf %81, %82 : vector<8x256xf32>
    %cst_57 = arith.constant 0.000000e+00 : f32
    %84 = vector.broadcast %cst_57 : f32 to vector<8x256xf32>
    %85 = arith.maximumf %83, %84 : vector<8x256xf32>
    %c0_58 = arith.constant 0 : index
    %c0_59 = arith.constant 0 : index
    %c0_60 = arith.constant 0 : index
    %86 = vector.load %arg7[%c0_58, %c0_59, %c0_60] : memref<1x8x256xf32, #tpu.memory_space<vmem>>, vector<1x8x256xf32>
    %87 = vector.shape_cast %86 : vector<1x8x256xf32> to vector<8x256xf32>
    %88 = vector.shape_cast %85 : vector<8x256xf32> to vector<1x8x256xf32>
    tpu.vector_store %arg7[%c0_58, %c0_59, %c0_60], %88 {strides = array<i32>} : memref<1x8x256xf32, #tpu.memory_space<vmem>>, vector<1x8x256xf32>,
    return
  }
  func.func @transform_0(%arg0: i32) -> (i32, i32, i32) {
    %c0_i32 = arith.constant 0 : i32
    %c0_i32_0 = arith.constant 0 : i32
    %c0_i32_1 = arith.constant 0 : i32
    return %arg0, %c0_i32, %c0_i32_0 : i32, i32, i32
  }
  func.func @transform_1(%arg0: i32) -> (i32, i32) {
    %c0_i32 = arith.constant 0 : i32
    %c0_i32_0 = arith.constant 0 : i32
    %c0_i32_1 = arith.constant 0 : i32
    return %c0_i32, %c0_i32_0 : i32, i32
  }
  func.func @transform_2(%arg0: i32) -> (i32, i32) {
    %c0_i32 = arith.constant 0 : i32
    %c0_i32_0 = arith.constant 0 : i32
    %c0_i32_1 = arith.constant 0 : i32
    return %c0_i32, %c0_i32_0 : i32, i32
  }
  func.func @transform_3(%arg0: i32) -> (i32, i32) {
    %c0_i32 = arith.constant 0 : i32
    %c0_i32_0 = arith.constant 0 : i32
    %c0_i32_1 = arith.constant 0 : i32
    return %c0_i32, %c0_i32_0 : i32, i32
  }
  func.func @transform_4(%arg0: i32) -> (i32, i32) {
    %c0_i32 = arith.constant 0 : i32
    %c0_i32_0 = arith.constant 0 : i32
    %c0_i32_1 = arith.constant 0 : i32
    return %c0_i32, %c0_i32_0 : i32, i32
  }
  func.func @transform_5(%arg0: i32) -> (i32, i32) {
    %c0_i32 = arith.constant 0 : i32
    %c0_i32_0 = arith.constant 0 : i32
    %c0_i32_1 = arith.constant 0 : i32
    return %c0_i32, %c0_i32_0 : i32, i32
  }
  func.func @transform_6(%arg0: i32) -> (i32, i32, i32) {
    %c0_i32 = arith.constant 0 : i32
    %c0_i32_0 = arith.constant 0 : i32
    %c0_i32_1 = arith.constant 0 : i32
    return %arg0, %c0_i32, %c0_i32_0 : i32, i32, i32
  }
}

</mosaic_0001>

<bundles_post_ra>
// kernel: tpu_custom_call.1
= control target key start
LH: loop header
LB: loop body
LE: loop exit
PB: predicated region body
PF: predicated region fallthrough
CT: control target
= control target key end

     0   :  { %11 = vsyncpa [#allocation5], 0  ;;  %s1614_s0 = inlined_call_operand.vmem [shape: f32[2,4,256], index: 0, kind: input, shape index: {}]   ;;  %s1615_s1 = inlined_call_operand.hbm [shape: f32[2,256], index: 1, kind: input, shape index: {}]   ;;  %s1616_s2 = inlined_call_operand.vmem [shape: f32[8,72], index: 2, kind: input, shape index: {}]   ;;  %s1617_s3 = inlined_call_operand.vmem [shape: f32[8,1], index: 3, kind: input, shape index: {}]   ;;  %s1618_s4 = inlined_call_operand.vmem [shape: f32[8,72], index: 4, kind: input, shape index: {}]   ;;  %s1619_s5 = inlined_call_operand.vmem [shape: f32[8,1], index: 5, kind: input, shape index: {}]   ;;  %s1620_s6 = inlined_call_operand.hbm [shape: f32[2,8,256], index: 6, kind: output, shape index: {}]  }
   0x1   :  { %12 = vsyncpa [#allocation6], 0 }
   0x2   :  { %14 = vsyncpa [#allocation6 + $0x1], 0  ;;  %s1253_s21 = smov 0   ;;  %s1255_s22 = smov 0  }
   0x3   :  { %s1257_s23 = smov 0   ;;  %s1259_s24 = smov 0  }
   0x4 LB: > { %s1274_s25 = sadd.s32 4294967295, %s1204_s24   ;;  %s927_s26 = sadd.s32 4294967294, %s1204_s24   ;;  %s1204_s24 = sphi %s1259_s24, %s1636_s24   ;;  %s1200_s23 = sphi %s1257_s23, %s1635_s23   ;;  %s1196_s22 = sphi %s1255_s22, %s1634_s22   ;;  %s1192_s21 = sphi %s1253_s21, %s1633_s21  }
   0x5   : > { %s1278_s27 = sadd.s32 1, %s1204_s24   ;;  %s158_s28 = sadd.s32 1, %s1200_s23 }
   0x6   : > { %s155_s29 = ssub.s32 %s1204_s24, %s1278_s27  ;;  %p168_p0 = scmp.ne.s32.totalorder %s1200_s23, %s1196_s22 }
   0x7   : > { %p156_p1 = scmp.eq.s32.totalorder %s155_s29, 0  ;;  %p169_p2 = scmp.eq.s32.totalorder %s1274_s25, 1 }
   0x8   : > { %p174_p3 = scmp.ne.s32.totalorder %s1196_s22, %s1192_s21  ;;  %p175_p4 = scmp.eq.s32.totalorder %s927_s26, 1 }
   0x9   : > { %s1289_s30 = scalar_select %p156_p1, %s1200_s23, %s158_s28  }
   0xa   : > { %p1291_p5 = por %p169_p2, %p168_p0  ;;  %p1295_p6 = por %p175_p4, %p174_p3 }
   0xb   : > { %p928_p7 = scmp.ge.s32.totalorder %s1204_s24, 1  ;;  %p182_p8 = scmp.lt.s32.totalorder %s1204_s24, 3 }
   0xc   : > { %s1624_s7 = scalar_select %p1291_p5, 1, 0 }
   0xd   : > { %s1625_s8 = scalar_select %p1295_p6, 1, 0 }
   0xe   : > { %p1621_p9 = scmp.eq.s32.totalorder %s1274_s25, 0  ;;  %p1302_p10 = pnand %p928_p7, %p182_p8 }
   0xf   : > { %s1206_s10 = smov [#allocation4]   ;;  %s1110_s15 = scalar_lea.hbm %s1615_s1, 64 }
  0x10   : > { %s1626_s9 = scalar_select %p1302_p10, 1, 0 }
  0x11   : > { %s195_s11 = sshll.u32 %s1206_s10, 4  ;;  %p983_p11 = pneg %p1302_p10  ;;  %s196_s11 = int_to_ptr.vmem [resolvable:$true] %s195_s11 }
  0x12   : > { %p1111_p13 = scmp.ne.s32.totalorder %s1615_s1, %s1110_s15  ;;  %p1117_p3 = scmp.lt.u32.totalorder %s1110_s15, %s1615_s1 }
  0x13   : > { %p1310_p12 = pnand %p1621_p9, %p983_p11 }
  0x15   : > { %p1112_p0 = pneg %p1310_p12 }
  0x17   : > { %p1113_p1 = pnand %p1112_p0, %p1111_p13 }
  0x19   : > { %p1114_p2 = pneg %p1113_p1 }
  0x1b   : > { %p1119_p4 = pnand %p1117_p3, %p1114_p2 }
  0x1d   : > { %1122 = shalt.err (!%p1119_p4)
}
  0x1e   : > { %s1123_s20 = scalar_lea.vmem %s196_s11, 64  ;;  %p1131_p9 = scmp.lt.s32.totalorder %s196_s11, %s196_s11 }
  0x1f   : > { %p1124_p7 = scmp.ne.s32.totalorder %s196_s11, %s1123_s20  ;;  %p1132_p6 = scmp.lt.s32.totalorder %s1123_s20, %s1123_s20 }
  0x21   : > { %p1126_p8 = pnand %p1124_p7, %p1112_p0  ;;  %p1133_p5 = por %p1132_p6, %p1131_p9 }
  0x23   : > { %p1127_p11 = pneg %p1126_p8 }
  0x25   : > { %p1134_p10 = pnand %p1133_p5, %p1127_p11 }
  0x27   : > { %1137 = shalt.err (!%p1134_p10)
}
  0x28   : > { %986 = dma.hbm_to_vmem [thread:$0]  (!%p1310_p12), %s1615_s1, 64, %s196_s11, [#allocation5]  }
  0x29   : > { %p1628_p13 = scmp.ne.s32.totalorder %s1626_s9, 0 }
  0x2a   : > { %p1629_p1 = scmp.eq.s32.totalorder (!%p1628_p13), %s1274_s25, 0 }
  0x2b   : > { %228 = sbr.rel (%p1628_p13) target bundleno = 920 (0x398), region = 44 }
  0x32   : > { %1183 = dma.done.wait (%p1629_p1), [#allocation5], 64   ;;  %p1630_p0 = pmov %p1629_p1 }
  0x33   : > { %v283_v0 = vlaneseq  ;;  %v1207_v1 = vmov 0.0   ;;  %p258_p5 = scmp.lt.s32.totalorder %s1274_s25, 1  ;;  %v265_v5 = vld [vmem:[#allocation4 + $0x1] ss:$2 sm:$0x3]  ;;  %s1208_s13 = smov 113  }
  0x34   : > { %1185 = vsyncadd (%p1630_p0), [#allocation5], 4294967232  ;;  %267 = vst [vmem:[#allocation2 + $0x8] sm:$0xff] %v1207_v1  ;;  %585 = vmatprep.mubr.f32.mxu0 %v1207_v1  ;;  %830 = vmatprep.mubr.f32.mxu1 %v1207_v1  ;;  %v263_v6 = vld [vmem:[#allocation4] ss:$2 sm:$0x3] }
  0x35   : > { %268 = vst [vmem:[#allocation2 + $0x10] sm:$0xff] %v1207_v1  ;;  %v284_v2 = vshrl.u32 %v283_v0, 7  ;;  %s259_s29 = scalar_select %p258_p5, %s1274_s25, 1  ;;  %v1213_v15 = vmov 0   ;;  %vm295_vm0 = vcmask 908288   ;;  %vm348_vm1 = vcmask 924672  }
  0x36   : > { %s1209_s14 = smov 111   ;;  %s1210_s15 = smov 127   ;;  %1072 = vset.pattern.permute.xlu1 %v1213_v15  ;;  %1108 = vset.pattern.permute.xlu0 %v1213_v15  ;;  %vm376_vm2 = vcmask 1039360   ;;  %vm393_vm3 = vcmask 7168   ;;  %vm365_vm4 = vcmask 121856   ;;  %vm312_vm5 = vcmask 138240  }
  0x37   : > { %v285_v3 = vsub.s32 0, %v284_v2  ;;  %v289_v4 = vsub.s32 1, %v284_v2  ;;  %s943_s9 = sshll.u32 %s259_s29, 3  ;;  %s1211_s16 = smov 1   ;;  %v272_v58 = vld [vmem:[%s1617_s3] sm:$0xff]  ;;  %vm328_vm6 = vcmask 130048  }
  0x38   : > { %s262_s12 = scalar_lea.vmem %s1614_s0, %s943_s9  ;;  %s1212_s17 = smov 15   ;;  %vm461_vm7 = vcmask 916480   ;;  %vm517_vm8 = vcmask 588800  }
  0x39   : > { %v339_v7 = vrot.slane %v265_v5, %v285_v3  ;;  %v286_v8 = vrot.slane %v263_v6, %v285_v3  ;;  %v343_v9 = vrot.slane %v265_v5, %v289_v4  ;;  %v290_v10 = vrot.slane %v263_v6, %v289_v4  ;;  %v270_v11 = vld [vmem:[%s262_s12] sm:$0xff]  ;;  %s1214_s18 = smov 17   ;;  %s1215_s19 = smov 16  }
  0x3a   : > { %v274_v12 = vcombine.high %v270_v11, %v270_v11  ;;  %276 = vst [vmem:[#allocation2 + $0x8] sm:$0xf] %v270_v11  ;;  %s1216_s20 = smov 112   ;;  %p1631_p9 = scmp.ne.s32.totalorder %s1624_s7, 0 }
  0x3b   : > { %344 = vrot.lane.b32.xlu1 %v339_v7, %s1208_s13  ;;  %291 = vrot.lane.b32.xlu0 %v286_v8, %s1209_s14 }
  0x3c   : > { %277 = vst [vmem:[#allocation2 + $0x10] sm:$0xf] %v274_v12 }
  0x3f   : > { %346 = vrot.lane.b32.xlu1 %v343_v9, %s1208_s13  ;;  %293 = vrot.lane.b32.xlu0 %v290_v10, %s1209_s14 }
  0x41   : > { %v1355_v13 = vld [vmem:[#allocation2 + $0x8] sm:$0xff] }
  0x43   : > { %374 = vrot.lane.b32.xlu1 %v290_v10, %s1210_s15  ;;  %372 = vrot.lane.b32.xlu0 %v286_v8, %s1210_s15  ;;  %v1357_v14 = vld [vmem:[#allocation2 + $0x10] sm:$0xff] }
  0x44   : > { %v1037_v16 = vpack.i.bf16 %v1357_v14, %v1355_v13  ;;  %v1057_v48 = vpack.i.bf16 %v1207_v1, %v1357_v14 }
  0x47   : > { %404 = vrot.lane.b32.xlu1 %v343_v9, %s1211_s16  ;;  %402 = vrot.lane.b32.xlu0 %v339_v7, %s1211_s16 }
  0x4b   : > { %430 = vrot.lane.b32.xlu1 %v290_v10, %s1212_s17  ;;  %428 = vrot.lane.b32.xlu0 %v286_v8, %s1212_s17 }
  0x4f   : > { %470 = vrot.lane.b32.xlu1 %v343_v9, %s1214_s18  ;;  %468 = vrot.lane.b32.xlu0 %v339_v7, %s1214_s18 }
  0x53   : > { %1038 = vrot.lane.b32.xlu1 %v1037_v16, %s1215_s19 }
  0x57   : > { %322 = vrot.lane.b32.xlu1 %v1207_v1, %s1215_s19 }
  0xad   : > { %v345_v17 = vpop.permute.xlu1 %344  ;;  %v292_v18 = vpop.permute.xlu0 %291 }
  0xae   : > { %v1366_v19 = vmul.f32 0.0, %v292_v18  ;;  %v1368_v20 = vmul.f32 0.0, %v345_v17 }
  0xb0   : > { %306 = vrot.lane.b32.xlu0 %v1366_v19, %s1214_s18 }
  0xb1   : > { %v1372_v21 = vpop.permute.xlu1 %346  ;;  %v1374_v22 = vpop.permute.xlu0 %293 }
  0xb2   : > { %v1378_v23 = vsel %vm295_vm0, %v292_v18, %v1374_v22  ;;  %v302_v24 = vmul.f32 %v1374_v22, %v1357_v14  ;;  %v1384_v25 = vsel %vm348_vm1, %v345_v17, %v1372_v21  ;;  %v355_v27 = vmul.f32 %v1372_v21, %v1357_v14 }
  0xb3   : > { %v301_v26 = vmul.f32 %v1378_v23, %v1355_v13  ;;  %v354_v31 = vmul.f32 %v1384_v25, %v1355_v13 }
  0xb4   : > { %359 = vrot.lane.b32.xlu0 %v1368_v20, %s1212_s17 }
  0xb5   : > { %v1392_v28 = vpop.permute.xlu1 %374  ;;  %v373_v29 = vpop.permute.xlu0 %372  ;;  %v1042_v30 = vpack.i.bf16 %v302_v24, %v301_v26  ;;  %v1047_v39 = vpack.i.bf16 %v355_v27, %v354_v31 }
  0xb6   : > { %v383_v32 = vmul.f32 %v1392_v28, %v1357_v14  ;;  %v1400_v33 = vsel %vm376_vm2, %v373_v29, %v1392_v28  ;;  %v381_v34 = vmul.f32 0.0, %v373_v29 }
  0xb7   : > { %v382_v35 = vmul.f32 %v1400_v33, %v1355_v13 }
  0xb8   : > { %1043 = vrot.lane.b32.xlu0 %v1042_v30, %s1214_s18  ;;  %387 = vrot.lane.b32.xlu1 %v381_v34, %s1211_s16 }
  0xb9   : > { %v405_v36 = vpop.permute.xlu1 %404  ;;  %v1406_v37 = vpop.permute.xlu0 %402  ;;  %v1052_v38 = vpack.i.bf16 %v383_v32, %v382_v35 }
  0xba   : > { %v1410_v40 = vsel %vm393_vm3, %v1406_v37, %v405_v36  ;;  %v1416_v43 = vmul.f32 0.0, %v405_v36  ;;  %v410_v44 = vmul.f32 %v1406_v37, %v1355_v13 }
  0xbb   : > { %v411_v45 = vmul.f32 %v1410_v40, %v1357_v14 }
  0xbc   : > { %1048 = vrot.lane.b32.xlu0 %v1047_v39, %s1212_s17  ;;  %1053 = vrot.lane.b32.xlu1 %v1052_v38, %s1211_s16 }
  0xbd   : > { %v431_v41 = vpop.permute.xlu1 %430  ;;  %v1414_v42 = vpop.permute.xlu0 %428  ;;  %v1062_v51 = vpack.i.bf16 %v1416_v43, %v411_v45 }
  0xbe   : > { %v436_v46 = vmul.f32 %v1414_v42, %v1355_v13  ;;  %v1426_v47 = vsel %vm365_vm4, %v1414_v42, %v431_v41  ;;  %v1432_v49 = vmul.f32 0.0, %v431_v41 }
  0xbf   : > { %v437_v50 = vmul.f32 %v1426_v47, %v1357_v14 }
  0xc0   : > { %416 = vrot.lane.b32.xlu1 %v410_v44, %s1210_s15  ;;  %442 = vrot.lane.b32.xlu0 %v436_v46, %s1208_s13 }
  0xc1   : > { %v471_v52 = vpop.permute.xlu1 %470  ;;  %v1437_v53 = vpop.permute.xlu0 %468  ;;  %v1067_v55 = vpack.i.bf16 %v1432_v49, %v437_v50 }
  0xc2   : > { %v1443_v54 = vsel %vm312_vm5, %v1437_v53, %v471_v52  ;;  %v1446_v56 = vmul.f32 0.0, %v471_v52  ;;  %v476_v59 = vmul.f32 %v1437_v53, %v1355_v13 }
  0xc3   : > { %v477_v57 = vmul.f32 %v1443_v54, %v1357_v14 }
  0xc4   : > { %1058 = vrot.lane.b32.xlu1 %v1057_v48, %s1216_s20  ;;  %1063 = vrot.lane.b32.xlu0 %v1062_v51, %s1210_s15 }
  0xc5   : > { %v1039_v60 = vpop.permute.xlu1 %1038 }
  0xc6   : > { %v1041_v0 = vunpack.i.h.bf16 %v1039_v60  ;;  %v1040_v2 = vunpack.i.l.bf16 %v1039_v60 }
  0xc8   : > { %455 = vrot.lane.b32.xlu1 %v1355_v13, %s1216_s20  ;;  %1068 = vrot.lane.b32.xlu0 %v1067_v55, %s1208_s13  ;;  %v330_v9 = vsel %vm328_vm6, %v1040_v2, %v1041_v0 }
  0xc9   : > { %v323_v62 = vpop.permute.xlu1 %322 }
  0xca   : > { %v329_v7 = vsel %vm328_vm6, %v323_v62, %v1040_v2 }
  0xcc   : > { %486 = vrot.lane.b32.xlu1 %v1446_v56, %s1209_s14  ;;  %484 = vrot.lane.b32.xlu0 %v477_v57, %s1209_s14 }
  0xd0   : > { %514 = vperm.xlu1 %1072, %v272_v58   ;;  %482 = vrot.lane.b32.xlu0 %v476_v59, %s1209_s14 }
  0xd4   : > { %623 = vrot.lane.b32.xlu1 %v1207_v1, %s1215_s19  ;;  %608 = vrot.lane.b32.xlu0 %v1366_v19, %s1214_s18 }
  0xd8   : > { %659 = vrot.lane.b32.xlu1 %v381_v34, %s1211_s16  ;;  %641 = vrot.lane.b32.xlu0 %v1368_v20, %s1212_s17 }
 0x122   : > { %v307_v61 = vpop.permute.xlu0 %306 }
 0x126   : > { %v360_v63 = vpop.permute.xlu0 %359 }
 0x12a   : > { %v388_v3 = vpop.permute.xlu1 %387  ;;  %v1044_v4 = vpop.permute.xlu0 %1043 }
 0x12b   : > { %v1046_v5 = vunpack.i.h.bf16 %v1044_v4  ;;  %v1045_v6 = vunpack.i.l.bf16 %v1044_v4  ;;  %v271_v4 = vld [vmem:[%s1616_s2] sm:$0xff] }
 0x12d   : > { %v314_v8 = vsel %vm312_vm5, %v1045_v6, %v1046_v5  ;;  %v313_v10 = vsel %vm312_vm5, %v307_v61, %v1045_v6 }
 0x12e   : > { %v1054_v11 = vpop.permute.xlu1 %1053  ;;  %v1049_v12 = vpop.permute.xlu0 %1048  ;;  %v945_v15 = vpack.c.bf16 %v330_v9, %v314_v8  ;;  %v947_v16 = vpack.c.bf16 %v329_v7, %v313_v10 }
 0x12f   : > { %v1056_v17 = vunpack.i.h.bf16 %v1054_v11  ;;  %v1055_v18 = vunpack.i.l.bf16 %v1054_v11  ;;  %v1051_v19 = vunpack.i.h.bf16 %v1049_v12  ;;  %v1050_v20 = vunpack.i.l.bf16 %v1049_v12 }
 0x130   : > { %946 = vmatprep.subr.bf16.mxu0 %v945_v15 }
 0x131   : > { %948 = vmatpush1.bf16.msra.mxu0 %v947_v16  ;;  %v367_v24 = vsel %vm365_vm4, %v1050_v20, %v1051_v19  ;;  %v395_v26 = vsel %vm393_vm3, %v1055_v18, %v1056_v17  ;;  %v366_v27 = vsel %vm365_vm4, %v360_v63, %v1050_v20  ;;  %v394_v29 = vsel %vm393_vm3, %v388_v3, %v1055_v18 }
 0x132   : > { %v417_v30 = vpop.permute.xlu1 %416  ;;  %v443_v31 = vpop.permute.xlu0 %442  ;;  %v949_v32 = vpack.c.bf16 %v395_v26, %v367_v24  ;;  %v951_v34 = vpack.c.bf16 %v394_v29, %v366_v27 }
 0x134   : > { %950 = vmatprep.subr.bf16.mxu0 %v949_v32 }
 0x135   : > { %952 = vmatpush1.bf16.msra.mxu0 %v951_v34 }
 0x136   : > { %v1059_v35 = vpop.permute.xlu1 %1058  ;;  %v1064_v36 = vpop.permute.xlu0 %1063 }
 0x137   : > { %v1061_v38 = vunpack.i.h.bf16 %v1059_v35  ;;  %v1060_v39 = vunpack.i.l.bf16 %v1059_v35  ;;  %v1066_v41 = vunpack.i.h.bf16 %v1064_v36  ;;  %v1065_v44 = vunpack.i.l.bf16 %v1064_v36 }
 0x139   : > { %v423_v45 = vsel %vm376_vm2, %v1065_v44, %v1066_v41  ;;  %v422_v46 = vsel %vm376_vm2, %v417_v30, %v1065_v44  ;;  %v463_v59 = vsel %vm461_vm7, %v1060_v39, %v1061_v38 }
 0x13a   : > { %v456_v48 = vpop.permute.xlu1 %455  ;;  %v1069_v50 = vpop.permute.xlu0 %1068  ;;  %v953_v51 = vpack.c.bf16 %v423_v45, %v1357_v14  ;;  %v955_v52 = vpack.c.bf16 %v422_v46, %v1355_v13 }
 0x13b   : > { %v462_v55 = vsel %vm461_vm7, %v456_v48, %v1060_v39  ;;  %v1071_v57 = vunpack.i.h.bf16 %v1069_v50  ;;  %v1070_v58 = vunpack.i.l.bf16 %v1069_v50 }
 0x13c   : > { %954 = vmatprep.subr.bf16.mxu0 %v953_v51 }
 0x13d   : > { %956 = vmatpush1.bf16.msra.mxu0 %v955_v52  ;;  %v449_v60 = vsel %vm348_vm1, %v1070_v58, %v1071_v57  ;;  %v448_v61 = vsel %vm348_vm1, %v443_v31, %v1070_v58 }
 0x13e   : > { %v487_v62 = vpop.permute.xlu1 %486  ;;  %v485_v63 = vpop.permute.xlu0 %484  ;;  %v957_v0 = vpack.c.bf16 %v463_v59, %v449_v60  ;;  %v959_v2 = vpack.c.bf16 %v462_v55, %v448_v61 }
 0x13f   : > { %v489_v13 = vsel %vm295_vm0, %v485_v63, %v487_v62 }
 0x140   : > { %958 = vmatprep.subr.bf16.mxu0 %v957_v0 }
 0x141   : > { %960 = vmatpush1.bf16.msra.mxu0 %v959_v2 }
 0x142   : > { %v483_v14 = vpop.permute.xlu0 %482  ;;  %537 = vmatprep.subr.mxu0 %v489_v13 }
 0x143   : > { %v488_v3 = vsel %vm295_vm0, %v483_v14, %v485_v63 }
 0x145   : > { %538 = vmatpush1.msra.mxu0 %v488_v3 }
 0x146   : > { %936 = vmatmul.mubr.msk.f32.vlgmr.msra.gmra.mrb[0].mxu0 %vm517_vm8, %v271_v4 }
 0x14f   : > { %v515_v5 = vpop.permute.xlu1 %514 }
 0x219   : > { %v587_v6 = vpop.f32.mrb[0].mxu0 }
 0x21a   : > { %v588_v7 = vadd.f32 %v587_v6, %v515_v5  ;;  %v589_v8 = vpop.f32.mrb[1].mxu0 }
 0x21b   : > { %v590_v9 = vadd.f32 %v589_v8, %v515_v5 }
 0x21c   : > { %v1491_v10 = vmax.f32 %v588_v7, 0.0 }
 0x21d   : > { %v1493_v11 = vmax.f32 %v590_v9, 0.0 }
 0x21e   : > { %596 = vst [vmem:[#allocation2 + $0x8] sm:$0xff] %v1491_v10  ;;  %v603_v12 = vmul.f32 %v1491_v10, %v1378_v23  ;;  %v654_v17 = vmul.f32 %v1491_v10, %v1400_v33  ;;  %v636_v23 = vmul.f32 %v1491_v10, %v1384_v25  ;;  %v691_v33 = vmul.f32 %v1491_v10, %v1414_v42 }
 0x21f   : > { %597 = vst [vmem:[#allocation2 + $0x10] sm:$0xff] %v1493_v11  ;;  %v1073_v15 = vpack.i.bf16 %v1493_v11, %v1491_v10  ;;  %v604_v16 = vmul.f32 %v1493_v11, %v1374_v22  ;;  %v655_v18 = vmul.f32 %v1493_v11, %v1392_v28  ;;  %v637_v20 = vmul.f32 %v1493_v11, %v1372_v21 }
 0x220   : > { %v673_v28 = vmul.f32 %v1491_v10, %v1406_v37  ;;  %v674_v25 = vmul.f32 %v1493_v11, %v1410_v40  ;;  %v1093_v21 = vpack.i.bf16 %v1207_v1, %v1493_v11  ;;  %v692_v37 = vmul.f32 %v1493_v11, %v1426_v47  ;;  %v595_v40 = vld [vmem:[%s1619_s5] sm:$0xff]  ;;  %v624_v47 = vpop.permute.xlu1 %623 }
 0x221   : > { %1074 = vrot.lane.b32.xlu1 %v1073_v15, %s1215_s19  ;;  %v1078_v19 = vpack.i.bf16 %v604_v16, %v603_v12  ;;  %v1088_v24 = vpack.i.bf16 %v655_v18, %v654_v17  ;;  %v1083_v22 = vpack.i.bf16 %v637_v20, %v636_v23  ;;  %v723_v1 = vmul.f32 %v1493_v11, %v1443_v54 }
 0x222   : > { %v1098_v26 = vpack.i.bf16 %v1416_v43, %v674_v25  ;;  %v1103_v42 = vpack.i.bf16 %v1432_v49, %v692_v37  ;;  %v722_v43 = vmul.f32 %v1491_v10, %v1437_v53  ;;  %v609_v49 = vpop.permute.xlu0 %608 }
 0x223   : > { %1079 = vrot.lane.b32.xlu0 %v1078_v19, %s1214_s18 }
 0x224   : > { %v660_v27 = vpop.permute.xlu1 %659 }
 0x225   : > { %1089 = vrot.lane.b32.xlu1 %v1088_v24, %s1211_s16  ;;  %s944_s16 = sshll.u32 %s1274_s25, 8  ;;  %s1217_s25 = smov [#allocation7]  }
 0x226   : > { %v642_v29 = vpop.permute.xlu0 %641  ;;  %s1572_s26 = scalar_lea.hbm %s1620_s6, %s944_s16  ;;  %s1142_s9 = sshll.u32 %s1217_s25, 4  ;;  %s1143_s9 = int_to_ptr.vmem [resolvable:$false] %s1142_s9 }
 0x227   : > { %1084 = vrot.lane.b32.xlu0 %v1083_v22, %s1212_s17  ;;  %s1144_s10 = scalar_lea.vmem %s1143_s9, 512 }
 0x229   : > { %679 = vrot.lane.b32.xlu1 %v673_v28, %s1210_s15 }
 0x22b   : > { %697 = vrot.lane.b32.xlu0 %v691_v33, %s1208_s13  ;;  %v594_v33 = vld [vmem:[%s1618_s4] sm:$0xff] }
 0x22d   : > { %1094 = vrot.lane.b32.xlu1 %v1093_v21, %s1216_s20 }
 0x22f   : > { %1099 = vrot.lane.b32.xlu0 %v1098_v26, %s1210_s15 }
 0x231   : > { %710 = vrot.lane.b32.xlu1 %v1491_v10, %s1216_s20 }
 0x233   : > { %1104 = vrot.lane.b32.xlu0 %v1103_v42, %s1208_s13 }
 0x235   : > { %732 = vrot.lane.b32.xlu1 %v1446_v56, %s1209_s14 }
 0x237   : > { %730 = vrot.lane.b32.xlu0 %v723_v1, %s1209_s14 }
 0x239   : > { %760 = vperm.xlu1 %1072, %v595_v40  }
 0x23b   : > { %728 = vrot.lane.b32.xlu0 %v722_v43, %s1209_s14  ;;  %s255_s14 = sand.u32 1, %s1196_s22  }
 0x23c   : > { %s933_s15 = sshll.u32 %s255_s14, 4  ;;  %s842_s28 = scalar_lea.sflag [#allocation6], %s255_s14 }
 0x23d   : > { %s257_s17 = scalar_lea.vmem [#allocation7], %s933_s15 }
 0x23e   : > { %s856_s18 = sshll.u32 %s257_s17, 4  ;;  %s1574_s18 = int_to_ptr.vmem [resolvable:$true] %s856_s18 }
 0x23f   : > { %s1138_s29 = scalar_lea.vmem %s1574_s18, 256  ;;  %p1145_p2 = scmp.lt.s32.totalorder %s1574_s18, %s1143_s9 }
 0x240   : > { %p1139_p6 = scmp.ne.s32.totalorder %s1574_s18, %s1138_s29  ;;  %p1146_p3 = scmp.lt.s32.totalorder %s1144_s10, %s1138_s29 }
 0x242   : > { %p1140_p10 = pnand %p1139_p6, %p1631_p9  ;;  %p1147_p4 = por %p1146_p3, %p1145_p2 }
 0x244   : > { %p1141_p12 = pneg %p1140_p10 }
 0x246   : > { %p1148_p7 = pnand %p1147_p4, %p1141_p12 }
 0x293   : > { %v1075_v56 = vpop.permute.xlu1 %1074 }
 0x294   : > { %v1077_v30 = vunpack.i.h.bf16 %v1075_v56  ;;  %v1076_v31 = vunpack.i.l.bf16 %v1075_v56 }
 0x295   : > { %v1080_v54 = vpop.permute.xlu0 %1079 }
 0x296   : > { %v1082_v32 = vunpack.i.h.bf16 %v1080_v54  ;;  %v1081_v34 = vunpack.i.l.bf16 %v1080_v54  ;;  %v630_v36 = vsel %vm328_vm6, %v1076_v31, %v1077_v30  ;;  %v629_v38 = vsel %vm328_vm6, %v624_v47, %v1076_v31 }
 0x297   : > { %v1090_v35 = vpop.permute.xlu1 %1089 }
 0x298   : > { %v1092_v39 = vunpack.i.h.bf16 %v1090_v35  ;;  %v1091_v41 = vunpack.i.l.bf16 %v1090_v35  ;;  %v615_v53 = vsel %vm312_vm5, %v1081_v34, %v1082_v32  ;;  %v614_v44 = vsel %vm312_vm5, %v609_v49, %v1081_v34 }
 0x299   : > { %v1085_v45 = vpop.permute.xlu0 %1084  ;;  %v961_v46 = vpack.c.bf16 %v630_v36, %v615_v53  ;;  %v963_v48 = vpack.c.bf16 %v629_v38, %v614_v44 }
 0x29a   : > { %v1087_v50 = vunpack.i.h.bf16 %v1085_v45  ;;  %v1086_v51 = vunpack.i.l.bf16 %v1085_v45  ;;  %v666_v57 = vsel %vm393_vm3, %v1091_v41, %v1092_v39  ;;  %v665_v59 = vsel %vm393_vm3, %v660_v27, %v1091_v41 }
 0x29b   : > { %v680_v52 = vpop.permute.xlu1 %679  ;;  %962 = vmatprep.subr.bf16.mxu1 %v961_v46 }
 0x29c   : > { %964 = vmatpush1.bf16.msra.mxu1 %v963_v48  ;;  %v648_v55 = vsel %vm365_vm4, %v1086_v51, %v1087_v50  ;;  %v647_v58 = vsel %vm365_vm4, %v642_v29, %v1086_v51 }
 0x29d   : > { %v698_v60 = vpop.permute.xlu0 %697  ;;  %v965_v61 = vpack.c.bf16 %v666_v57, %v648_v55  ;;  %v967_v62 = vpack.c.bf16 %v665_v59, %v647_v58 }
 0x29f   : > { %v1095_v63 = vpop.permute.xlu1 %1094  ;;  %966 = vmatprep.subr.bf16.mxu1 %v965_v61 }
 0x2a0   : > { %968 = vmatpush1.bf16.msra.mxu1 %v967_v62  ;;  %v1097_v14 = vunpack.i.h.bf16 %v1095_v63  ;;  %v1096_v3 = vunpack.i.l.bf16 %v1095_v63 }
 0x2a1   : > { %v1100_v0 = vpop.permute.xlu0 %1099 }
 0x2a2   : > { %v1102_v2 = vunpack.i.h.bf16 %v1100_v0  ;;  %v1101_v13 = vunpack.i.l.bf16 %v1100_v0  ;;  %v717_v18 = vsel %vm461_vm7, %v1096_v3, %v1097_v14 }
 0x2a3   : > { %v711_v6 = vpop.permute.xlu1 %710 }
 0x2a4   : > { %v686_v4 = vsel %vm376_vm2, %v1101_v13, %v1102_v2  ;;  %v685_v5 = vsel %vm376_vm2, %v680_v52, %v1101_v13  ;;  %v716_v16 = vsel %vm461_vm7, %v711_v6, %v1096_v3 }
 0x2a5   : > { %v1105_v7 = vpop.permute.xlu0 %1104  ;;  %v969_v8 = vpack.c.bf16 %v686_v4, %v1493_v11  ;;  %v971_v9 = vpack.c.bf16 %v685_v5, %v1491_v10 }
 0x2a6   : > { %v1107_v12 = vunpack.i.h.bf16 %v1105_v7  ;;  %v1106_v15 = vunpack.i.l.bf16 %v1105_v7 }
 0x2a7   : > { %970 = vmatprep.subr.bf16.mxu1 %v969_v8  ;;  %v733_v22 = vpop.permute.xlu1 %732 }
 0x2a8   : > { %972 = vmatpush1.bf16.msra.mxu1 %v971_v9  ;;  %v704_v17 = vsel %vm348_vm1, %v1106_v15, %v1107_v12  ;;  %v703_v19 = vsel %vm348_vm1, %v698_v60, %v1106_v15 }
 0x2a9   : > { %v731_v23 = vpop.permute.xlu0 %730  ;;  %v973_v20 = vpack.c.bf16 %v717_v18, %v704_v17  ;;  %v975_v24 = vpack.c.bf16 %v716_v16, %v703_v19 }
 0x2aa   : > { %v735_v10 = vsel %vm295_vm0, %v731_v23, %v733_v22 }
 0x2ab   : > { %974 = vmatprep.subr.bf16.mxu1 %v973_v20 }
 0x2ac   : > { %976 = vmatpush1.bf16.msra.mxu1 %v975_v24 }
 0x2ad   : > { %v729_v11 = vpop.permute.xlu0 %728  ;;  %782 = vmatprep.subr.mxu1 %v735_v10 }
 0x2ae   : > { %v734_v28 = vsel %vm295_vm0, %v729_v11, %v731_v23 }
 0x2b0   : > { %783 = vmatpush1.msra.mxu1 %v734_v28 }
 0x2b1   : > { %937 = vmatmul.mubr.msk.f32.vlgmr.msra.gmra.mrb[0].mxu1 %vm517_vm8, %v594_v33 }
 0x2b8   : > { %v761_v25 = vpop.permute.xlu1 %760 }
 0x384   : > { %v832_v21 = vpop.f32.mrb[0].mxu1 }
 0x385   : > { %v833_v26 = vadd.f32 %v832_v21, %v761_v25  ;;  %v834_v37 = vpop.f32.mrb[1].mxu1 }
 0x386   : > { %v835_v42 = vadd.f32 %v834_v37, %v761_v25 }
 0x387   : > { %v837_v1 = vmax.f32 %v833_v26, 0.0 }
 0x388   : > { %v838_v40 = vmax.f32 %v835_v42, 0.0 }
 0x389   : > { %839 = vst [vmem:[%s257_s17] sm:$0xff] %v837_v1 }
 0x38a   : > { %840 = vst [vmem:[%s257_s17 + $0x8] sm:$0xff] %v838_v40 }
 0x38b   : > { %1151 = shalt.err (!%p1148_p7)
}
 0x38c   : > { %s1152_s11 = scalar_lea.hbm %s1572_s26, 256  ;;  %s1156_s14 = scalar_lea.hbm %s1620_s6, 512 }
 0x38d   : > { %p1153_p8 = scmp.ne.s32.totalorder %s1572_s26, %s1152_s11  ;;  %p1157_p1 = scmp.lt.u32.totalorder %s1572_s26, %s1620_s6 }
 0x38e   : > { %p1158_p0 = scmp.lt.u32.totalorder %s1156_s14, %s1152_s11  ;;  %p1160_p6 = scmp.lt.u32.totalorder %s1152_s11, %s1572_s26 }
 0x38f   : > { %p1154_p11 = pnand %p1153_p8, %p1631_p9 }
 0x390   : > { %p1159_p5 = por %p1158_p0, %p1157_p1 }
 0x391   : > { %p1155_p13 = pneg %p1154_p11 }
 0x392   : > { %p1161_p10 = por %p1160_p6, %p1159_p5 }
 0x394   : > { %p1162_p12 = pnand %p1161_p10, %p1155_p13 }
 0x396   : > { %1165 = shalt.err (!%p1162_p12)
}
 0x397   : > { %981 = dma.vmem_to_hbm [thread:$0]  (%p1631_p9), %s1574_s18, 256, %s1572_s26, %s842_s28  }
 0x398 PF: > { %p993_p2 = scmp.ge.s32.totalorder %s1204_s24, 2  ;;  %s868_s17 = sand.u32 1, %s1192_s21  }
 0x399   : > { %p1632_p3 = scmp.ne.s32.totalorder %s1625_s8, 0  ;;  %s869_s19 = scalar_lea.sflag [#allocation6], %s868_s17 }
 0x39b   : > { %p988_p4 = pnand %p993_p2, %p1632_p3 }
 0x39d   : > { %1187 = dma.done.wait (!%p988_p4), %s869_s19, 256  }
 0x39e   : > { %1189 = vsyncadd (!%p988_p4), %s869_s19, 4294967040  ;;  %p17_p7 = scmp.ge.s32.totalorder %s1278_s27, 4   ;;  %s1633_s21 = smov %s1196_s22 }
 0x39f   : > { %s1634_s22 = smov %s1200_s23  ;;  %s1635_s23 = smov %s1289_s30 }
 0x3a0   : > { %s1636_s24 = smov %s1278_s27  ;;  %19 = sbr.rel (!%p17_p7) target bundleno = 4 (0x4), region = 85 }
 0x3a7   :  { %874 = vsyncpa [#allocation5], 1 }
 0x3a8   :  { %876 = vsyncpa [#allocation5 + $0x1], 1 }
 0x3a9   :  { %877 = vsyncpa [#allocation6], 1 }
 0x3aa   :  { %879 = vsyncpa [#allocation6 + $0x1], 1 }

</bundles_post_ra>
